<compile_context>
chip_gen: v7x
topology: tpu7x:2x2x1
jax: 0.10.0
libtpu: 0.0.40
codegen_flags: <defaults>
</compile_context>

<pallas_src>
import functools

import jax
import jax.numpy as jnp
import numpy as np
from jax import lax
from jax.experimental import pallas as pl
from jax.experimental.pallas import tpu as pltpu

KH = KW = 4
N_TAPS = KH * KW
NEG_SLOPE = 0.2
IN_EPS = 1e-5
LANE = 128
ROW_ALIGN = 16  # row-group padding => every in-kernel slice is (16,128)-tile aligned


def _round_up(x, m):
    return ((x + m - 1) // m) * m


def _vmem_limit_bytes():
    """Per-chip VMEM budget: ~3/4 of physical, capped at 96 MiB."""
    cap = 64 * 1024 * 1024
    try:
        info = pltpu.get_tpu_info()
        cap = int(getattr(info, "vmem_capacity_bytes", cap))
    except Exception:
        pass
    return max(32 * 1024 * 1024, min((cap * 3) // 4, 96 * 1024 * 1024))


# ---------------------------------------------------------------------------
# Pallas kernel: K-folded MXU matmuls + bias / InstanceNorm / LeakyReLU
# ---------------------------------------------------------------------------
def _conv_block_kernel(s_ref, w_ref, b_ref, o_ref, acc_ref, *,
                       taps, rows, wo_pad, wo, has_bias, use_in, use_act):
    # Every lhs slice is tile aligned (row0 is a multiple of 16, full minor dim).
    if len(taps) == 1:
        src0, row0 = taps[0]
        acc = jnp.dot(s_ref[0, src0, pl.ds(row0, rows), :], w_ref[0],
                      preferred_element_type=jnp.float32)
    else:
        for t, (src, row0) in enumerate(taps):
            lhs = s_ref[0, src, pl.ds(row0, rows), :]            # (rows, K) bf16
            contrib = jnp.dot(lhs, w_ref[t], preferred_element_type=jnp.float32)
            if t == 0:
                acc_ref[...] = contrib
            else:
                acc_ref[...] += contrib
        acc = acc_ref[...]

    if has_bias:
        acc = acc + b_ref[...]                                   # (1, Cout) broadcast

    if use_in:
        # InstanceNorm2d (biased var, no affine).  Padding columns of the
        # sources (and padded K channels) are exact zeros and IN layers have
        # no bias, so full-row sums already equal valid-entry sums; only the
        # counts need correcting.
        n_valid = (rows // wo_pad) * wo                          # Ho * Wo
        n_garb = rows - n_valid
        mean = jnp.sum(acc, axis=0, keepdims=True) * (1.0 / n_valid)
        cen = acc - mean
        var = (jnp.sum(cen * cen, axis=0, keepdims=True)
               - float(n_garb) * mean * mean) * (1.0 / n_valid)
        acc = cen * lax.rsqrt(var + IN_EPS)

    if use_act:
        acc = jnp.where(acc >= 0, acc, NEG_SLOPE * acc)

    o_ref[0] = acc.astype(o_ref.dtype)


# ---------------------------------------------------------------------------
# JAX glue: build tap sources (no 16x im2col materialization)
# ---------------------------------------------------------------------------
def _fold_taps_into_k(xp, stride, ho, wo, wo_pad):
    """Full im2col with all 16 taps folded into K. Only used when 16*Cin <= 128."""
    n, hp, wp, cin = xp.shape
    cols = []
    for kh in range(KH):
        for kw in range(KW):
            cols.append(lax.slice(
                xp, (0, kh, kw, 0),
                (n, kh + stride * (ho - 1) + 1, kw + stride * (wo - 1) + 1, cin),
                (1, stride, stride, 1)))
    p = jnp.concatenate(cols, axis=-1)                           # (N, Ho, Wo, 16*Cin)
    if wo_pad != wo:
        p = jnp.pad(p, ((0, 0), (0, 0), (0, wo_pad - wo), (0, 0)))
    src = p.reshape(n, 1, ho * wo_pad, N_TAPS * cin)
    taps = ((0, 0),)
    return src, taps


def _split_tap_sources_folded(xp, stride, ho, wo, wo_pad):
    """kw taps folded into channels.  stride 1 -> 1 source (N, Hp, Wo, 4*Cin);
    stride 2 -> 2 row-phase sources (N, Ho+1, Wo, 4*Cin).  Each kh row-group
    becomes ONE K=4*Cin matmul whose lhs is a tile-aligned contiguous row
    slice of one source inside the kernel.  Total bytes ~1-2x the input."""
    n, hp, wp, cin = xp.shape
    if stride == 1:
        hs = hp
        cols = [xp[:, :, kw:kw + wo, :] for kw in range(KW)]
        srcs = [jnp.concatenate(cols, axis=-1)]                  # (N, Hp, Wo, 4*Cin)
        taps = tuple((0, kh * wo_pad) for kh in range(KH))
    else:
        hs = ho + 1
        srcs = []
        for ph in range(2):
            cols = [xp[:, ph::2, kw::2, :][:, :hs, :wo, :] for kw in range(KW)]
            srcs.append(jnp.concatenate(cols, axis=-1))          # (N, Ho+1, Wo, 4*Cin)
        taps = tuple((kh % 2, (kh // 2) * wo_pad) for kh in range(KH))
    src = jnp.stack(srcs, axis=1)                                # (N, S, hs, Wo, 4*Cin)
    if wo_pad != wo:
        src = jnp.pad(src, ((0, 0), (0, 0), (0, 0), (0, wo_pad - wo), (0, 0)))
    return src.reshape(n, len(srcs), hs * wo_pad, KW * cin), taps


def conv_block(x_nhwc, w, b, *, stride, has_bias, use_in, use_act,
               out_dtype=jnp.float32):
    """Conv2d(4x4, reflect pad 1, stride) [+ bias] [+ InstanceNorm] [+ LeakyReLU]."""
    n, h, w_sp, cin = x_nhwc.shape
    cout = w.shape[-1]

    xb = x_nhwc.astype(jnp.bfloat16)                             # bf16 feeds the MXU
    xp = jnp.pad(xb, ((0, 0), (1, 1), (1, 1), (0, 0)), mode="reflect")
    hp, wp = h + 2, w_sp + 2
    ho = (hp - KH) // stride + 1
    wo = (wp - KW) // stride + 1
    wo_pad = _round_up(wo, ROW_ALIGN)
    rows = ho * wo_pad

    # Lane-pad tiny Cout (final layer, Cout=1) so stores are unmasked.
    cout_pad = LANE if cout < 8 else cout

    if N_TAPS * cin <= LANE:
        # First layer: fold all 16 taps into K and zero-pad K to 128 so lhs
        # loads are full-lane and K fills exactly one 128-wide MXU pass.
        src, taps = _fold_taps_into_k(xp, stride, ho, wo, wo_pad)
        k_raw = N_TAPS * cin
        k_pad = _round_up(k_raw, LANE)
        wk = w.reshape(1, k_raw, cout)
        if k_pad != k_raw:
            src = jnp.pad(src, ((0, 0), (0, 0), (0, 0), (0, k_pad - k_raw)))
            wk = jnp.pad(wk, ((0, 0), (0, k_pad - k_raw), (0, 0)))
    else:
        # kw taps folded into K => 4 matmuls with K = 4*Cin per sample.
        src, taps = _split_tap_sources_folded(xp, stride, ho, wo, wo_pad)
        wk = w.reshape(KH, KW * cin, cout)

    if cout_pad != cout:
        wk = jnp.pad(wk, ((0, 0), (0, 0), (0, cout_pad - cout)))

    n_src, ls, k_dim = src.shape[1], src.shape[2], src.shape[3]

    b2 = b.reshape(1, cout).astype(jnp.float32)
    if cout_pad != cout:
        b2 = jnp.pad(b2, ((0, 0), (0, cout_pad - cout)))

    kernel = functools.partial(
        _conv_block_kernel, taps=taps, rows=rows, wo_pad=wo_pad, wo=wo,
        has_bias=has_bias, use_in=use_in, use_act=use_act)

    out = pl.pallas_call(
        kernel,
        out_shape=jax.ShapeDtypeStruct((n, rows, cout_pad), out_dtype),
        grid_spec=pltpu.PrefetchScalarGridSpec(
            num_scalar_prefetch=0,
            grid=(n,),
            in_specs=[
                # Per-sample bf16 tap sources, whole sample resident in VMEM.
                pl.BlockSpec((1, n_src, ls, k_dim), lambda i: (i, 0, 0, 0)),
                # Weights: grid-invariant block -> DMA'd once, stays resident.
                pl.BlockSpec(wk.shape, lambda i: (0, 0, 0)),
                pl.BlockSpec((1, cout_pad), lambda i: (0, 0)),
            ],
            out_specs=pl.BlockSpec((1, rows, cout_pad), lambda i: (i, 0, 0)),
            scratch_shapes=[pltpu.VMEM((rows, cout_pad), jnp.float32)],
        ),
        compiler_params=pltpu.CompilerParams(
            dimension_semantics=("parallel",),
            vmem_limit_bytes=_vmem_limit_bytes()),
    )(src, wk, b2)

    return out.reshape(n, ho, wo_pad, cout_pad)[:, :, :wo, :cout]


# ---------------------------------------------------------------------------
# Discriminator: parameter setup + forward
# ---------------------------------------------------------------------------
def init_discriminator_params(key, in_channels=3, features=(64, 128, 256, 512)):
    specs = []
    cin = in_channels * 2
    specs.append((cin, features[0], 2, True, False, True))          # initial
    c = features[0]
    for f in features[1:]:
        stride = 1 if f == features[-1] else 2
        specs.append((c, f, stride, False, True, True))             # DiscBlock
        c = f
    specs.append((c, 1, 1, True, False, False))                     # final conv

    params = []
    for (ci, co, stride, has_bias, use_in, use_act) in specs:
        key, wk, bk = jax.random.split(key, 3)
        fan_in = ci * KH * KW
        bound = 1.0 / float(np.sqrt(fan_in))
        w = jax.random.uniform(wk, (N_TAPS, ci, co), jnp.float32, -bound, bound)
        b = (jax.random.uniform(bk, (co,), jnp.float32, -bound, bound)
             if has_bias else jnp.zeros((co,), jnp.float32))
        params.append(dict(w=w.astype(jnp.bfloat16),   # weights stored bf16 once
                           b=b, stride=stride, has_bias=has_bias,
                           use_in=use_in, use_act=use_act))
    return params


def discriminator_forward(params, x_nchw, y_nchw):
    x = jnp.concatenate([x_nchw, y_nchw], axis=1)            # (N, 2C, H, W)
    h = jnp.transpose(x, (0, 2, 3, 1))                       # NCHW -> NHWC
    last = len(params) - 1
    for li, p in enumerate(params):
        h = conv_block(h, p["w"], p["b"], stride=p["stride"],
                       has_bias=p["has_bias"], use_in=p["use_in"],
                       use_act=p["use_act"],
                       out_dtype=jnp.float32 if li == last else jnp.bfloat16)
    return jnp.transpose(h, (0, 3, 1, 2))                    # NHWC -> NCHW


# ---------------------------------------------------------------------------
# Pure-JAX reference (same bf16 input/weight quantization, f32 accumulation)
# ---------------------------------------------------------------------------
def _reference_forward(params, x_nchw, y_nchw):
    x = jnp.concatenate([x_nchw, y_nchw], axis=1)
    h = jnp.transpose(x, (0, 2, 3, 1))
    last = len(params) - 1
    for li, p in enumerate(params):
        hb = h.astype(jnp.bfloat16)
        xp = jnp.pad(hb, ((0, 0), (1, 1), (1, 1), (0, 0)), mode="reflect")
        cin = hb.shape[-1]
        cout = p["w"].shape[-1]
        w_hwio = p["w"].reshape(KH, KW, cin, cout)           # bf16
        out = lax.conv_general_dilated(
            xp, w_hwio, window_strides=(p["stride"], p["stride"]),
            padding="VALID", dimension_numbers=("NHWC", "HWIO", "NHWC"),
            preferred_element_type=jnp.float32)
        if p["has_bias"]:
            out = out + p["b"][None, None, None, :]
        if p["use_in"]:
            mean = jnp.mean(out, axis=(1, 2), keepdims=True)
            var = jnp.mean((out - mean) ** 2, axis=(1, 2), keepdims=True)
            out = (out - mean) * lax.rsqrt(var + IN_EPS)
        if p["use_act"]:
            out = jnp.where(out >= 0, out, NEG_SLOPE * out)
        h = out if li == last else out.astype(jnp.bfloat16)
    return jnp.transpose(h, (0, 3, 1, 2))


if __name__ == "__main__":
    key = jax.random.PRNGKey(0)
    pkey, xkey, ykey = jax.random.split(key, 3)

    N, C, H, W = 2, 3, 32, 32                  # small but deep enough for 5 convs
    x = jax.random.normal(xkey, (N, C, H, W), jnp.float32)
    y = jax.random.normal(ykey, (N, C, H, W), jnp.float32)

    params = init_discriminator_params(pkey, in_channels=C)

    out = discriminator_forward(params, x, y)
    out = jax.block_until_ready(out)
    assert out.shape == (N, 1, 2, 2), out.shape

    ref = jax.block_until_ready(_reference_forward(params, x, y))
    np.testing.assert_allclose(np.asarray(out), np.asarray(ref),
                               atol=2e-3, rtol=2e-3)

    print("KERNEL_OK")
</pallas_src>

<mosaic_0001>
module attributes {stable_mosaic.version = 11 : i64} {
  func.func @_conv_block_kernel(%arg0: i32, %arg1: memref<1x1x256x128xbf16, #tpu.memory_space<vmem>>, %arg2: memref<1x128x64xbf16, #tpu.memory_space<vmem>>, %arg3: memref<1x64xf32, #tpu.memory_space<vmem>>, %arg4: memref<1x256x64xbf16, #tpu.memory_space<vmem>>, %arg5: memref<256x64xf32, #tpu.memory_space<vmem>>) attributes {dimension_semantics = [#tpu.dimension_semantics<parallel>], iteration_bounds = array<i64: 2>, scalar_prefetch = 0 : i64, scratch_operands = 1 : i64, tpu.core_type = #tpu.core_type<tc>, window_params = [{transform_indices = @transform_0, window_bounds = array<i64: 1, 1, 256, 128>}, {pipeline_mode = #tpu.pipeline_mode<synchronous>, transform_indices = @transform_1, window_bounds = array<i64: 1, 128, 64>}, {pipeline_mode = #tpu.pipeline_mode<synchronous>, transform_indices = @transform_2, window_bounds = array<i64: 1, 64>}, {transform_indices = @transform_3, window_bounds = array<i64: 1, 256, 64>}]} {
    %c0 = arith.constant 0 : index
    %c0_0 = arith.constant 0 : index
    %c0_1 = arith.constant 0 : index
    %c0_2 = arith.constant 0 : index
    %0 = vector.load %arg1[%c0, %c0_0, %c0_1, %c0_2] : memref<1x1x256x128xbf16, #tpu.memory_space<vmem>>, vector<1x1x256x128xbf16>
    %1 = vector.shape_cast %0 : vector<1x1x256x128xbf16> to vector<256x128xbf16>
    %c0_3 = arith.constant 0 : index
    %c0_4 = arith.constant 0 : index
    %c0_5 = arith.constant 0 : index
    %2 = vector.load %arg2[%c0_3, %c0_4, %c0_5] : memref<1x128x64xbf16, #tpu.memory_space<vmem>>, vector<1x128x64xbf16>
    %3 = vector.shape_cast %2 : vector<1x128x64xbf16> to vector<128x64xbf16>
    %cst = arith.constant dense<0.000000e+00> : vector<256x64xf32>
    %4 = tpu.matmul %1, %3, %cst {dimension_numbers = #tpu.dot_dimension_numbers<[1], [0], [0], [1], [0, 0, 1, 1], [], []>} : vector<256x128xbf16>, vector<128x64xbf16>, vector<256x64xf32> -> vector<256x64xf32>
    %c0_6 = arith.constant 0 : index
    %c0_7 = arith.constant 0 : index
    %5 = vector.load %arg3[%c0_6, %c0_7] : memref<1x64xf32, #tpu.memory_space<vmem>>, vector<1x64xf32>
    %6 = vector.broadcast %5 : vector<1x64xf32> to vector<256x64xf32>
    %7 = arith.addf %4, %6 : vector<256x64xf32>
    %cst_8 = arith.constant 0.000000e+00 : f32
    %8 = vector.broadcast %cst_8 : f32 to vector<256x64xf32>
    %9 = arith.cmpf oge, %7, %8 : vector<256x64xf32>
    %cst_9 = arith.constant 2.000000e-01 : f32
    %10 = vector.broadcast %cst_9 : f32 to vector<256x64xf32>
    %11 = arith.mulf %10, %7 : vector<256x64xf32>
    %12 = arith.select %9, %7, %11 : vector<256x64xi1>, vector<256x64xf32>
    %13 = arith.truncf %12 : vector<256x64xf32> to vector<256x64xbf16>
    %c0_10 = arith.constant 0 : index
    %c0_11 = arith.constant 0 : index
    %c0_12 = arith.constant 0 : index
    %14 = vector.load %arg4[%c0_10, %c0_11, %c0_12] : memref<1x256x64xbf16, #tpu.memory_space<vmem>>, vector<1x256x64xbf16>
    %15 = vector.shape_cast %14 : vector<1x256x64xbf16> to vector<256x64xbf16>
    %16 = vector.shape_cast %13 : vector<256x64xbf16> to vector<1x256x64xbf16>
    tpu.vector_store %arg4[%c0_10, %c0_11, %c0_12], %16 {strides = array<i32>} : memref<1x256x64xbf16, #tpu.memory_space<vmem>>, vector<1x256x64xbf16>,
    return
  }
  func.func @transform_0(%arg0: i32) -> (i32, i32, i32, i32) {
    %c0_i32 = arith.constant 0 : i32
    %c0_i32_0 = arith.constant 0 : i32
    %c0_i32_1 = arith.constant 0 : i32
    %c0_i32_2 = arith.constant 0 : i32
    return %arg0, %c0_i32, %c0_i32_0, %c0_i32_1 : i32, i32, i32, i32
  }
  func.func @transform_1(%arg0: i32) -> (i32, i32, i32) {
    %c0_i32 = arith.constant 0 : i32
    %c0_i32_0 = arith.constant 0 : i32
    %c0_i32_1 = arith.constant 0 : i32
    %c0_i32_2 = arith.constant 0 : i32
    return %c0_i32, %c0_i32_0, %c0_i32_1 : i32, i32, i32
  }
  func.func @transform_2(%arg0: i32) -> (i32, i32) {
    %c0_i32 = arith.constant 0 : i32
    %c0_i32_0 = arith.constant 0 : i32
    %c0_i32_1 = arith.constant 0 : i32
    return %c0_i32, %c0_i32_0 : i32, i32
  }
  func.func @transform_3(%arg0: i32) -> (i32, i32, i32) {
    %c0_i32 = arith.constant 0 : i32
    %c0_i32_0 = arith.constant 0 : i32
    %c0_i32_1 = arith.constant 0 : i32
    return %arg0, %c0_i32, %c0_i32_0 : i32, i32, i32
  }
}

</mosaic_0001>

<bundles_post_ra>
// kernel: tpu_custom_call.1
= control target key start
LH: loop header
LB: loop body
LE: loop exit
PB: predicated region body
PF: predicated region fallthrough
CT: control target
= control target key end

     0   :  { %8 = vsyncpa [#allocation4], 0  ;;  %s1475_s0 = inlined_call_operand.hbm [shape: bf16[2,1,256,128], index: 0, kind: input, shape index: {}]   ;;  %s1476_s1 = inlined_call_operand.vmem [shape: bf16[1,128,64], index: 1, kind: input, shape index: {}]   ;;  %s1477_s2 = inlined_call_operand.vmem [shape: f32[1,64], index: 2, kind: input, shape index: {}]   ;;  %s1478_s3 = inlined_call_operand.vmem [shape: bf16[2,256,64], index: 3, kind: output, shape index: {}]  }
   0x1   :  { %10 = vsyncpa [#allocation4 + $0x1], 0  ;;  %s1221_s12 = smov 0   ;;  %s1223_s13 = smov 0  }
   0x2   :  { %s1225_s14 = smov 0   ;;  %s1227_s15 = smov 0  }
   0x3 LB: > { %s1240_s16 = sadd.s32 4294967295, %s1196_s15   ;;  %s1243_s17 = sadd.s32 1, %s1196_s15   ;;  %s1196_s15 = sphi %s1227_s15, %s1485_s15   ;;  %s1192_s14 = sphi %s1225_s14, %s1484_s14   ;;  %s1188_s13 = sphi %s1223_s13, %s1483_s13   ;;  %s1184_s12 = sphi %s1221_s12, %s1482_s12  }
   0x4   : > { %s20_s18 = ssub.s32 %s1196_s15, %s1243_s17  ;;  %s23_s19 = sadd.s32 1, %s1192_s14 }
   0x5   : > { %p21_p0 = scmp.eq.s32.totalorder %s20_s18, 0  ;;  %p30_p1 = scmp.ne.s32.totalorder %s1192_s14, %s1188_s13 }
   0x6   : > { %p31_p2 = scmp.eq.s32.totalorder %s1196_s15, 0  ;;  %p36_p3 = scmp.ne.s32.totalorder %s1188_s13, %s1184_s12 }
   0x7   : > { %s1253_s20 = scalar_select %p21_p0, %s1192_s14, %s23_s19  }
   0x8   : > { %p32_p4 = por %p31_p2, %p30_p1  ;;  %p37_p5 = scmp.eq.s32.totalorder %s1240_s16, 0 }
   0x9   : > { %p1073_p6 = scmp.lt.s32.totalorder %s1196_s15, 2  ;;  %s134_s22 = sand.u32 1, %s1192_s14  }
   0xa   : > { %p1257_p7 = por %p37_p5, %p36_p3  ;;  %s879_s23 = sshll.u32 %s134_s22, 7 }
   0xb   : > { %s945_s24 = sshll.u32 %s1196_s15, 11  ;;  %s138_s28 = scalar_lea.vmem [#allocation3], %s879_s23 }
   0xc   : > { %s1266_s27 = scalar_lea.hbm %s1475_s0, %s945_s24  ;;  %s145_s29 = sshll.u32 %s138_s28, 4  ;;  %s1268_s29 = int_to_ptr.vmem [resolvable:$true] %s145_s29 }
   0xd   : > { %p1270_p8 = pnand %p1073_p6, %p32_p4  ;;  %s1275_s4 = scalar_lea.sflag [#allocation4], %s134_s22 }
   0xe   : > { %s1132_s5 = scalar_lea.hbm %s1266_s27, 2048  ;;  %s1137_s8 = scalar_lea.hbm %s1475_s0, 4096 }
   0xf   : > { %p1133_p10 = scmp.ne.s32.totalorder %s1266_s27, %s1132_s5  ;;  %p1134_p11 = pneg %p1270_p8 }
  0x10   : > { %p1138_p0 = scmp.lt.u32.totalorder %s1266_s27, %s1475_s0  ;;  %p1139_p1 = scmp.lt.u32.totalorder %s1137_s8, %s1132_s5 }
  0x11   : > { %p1135_p12 = pnand %p1134_p11, %p1133_p10  ;;  %p1141_p3 = scmp.lt.u32.totalorder %s1132_s5, %s1266_s27 }
  0x12   : > { %p1140_p2 = por %p1139_p1, %p1138_p0 }
  0x13   : > { %p1136_p13 = pneg %p1135_p12 }
  0x14   : > { %p1142_p4 = por %p1141_p3, %p1140_p2 }
  0x16   : > { %p1143_p5 = pnand %p1142_p4, %p1136_p13 }
  0x18   : > { %1146 = shalt.err (!%p1143_p5)
}
  0x19   : > { %s1147_s11 = scalar_lea.vmem %s1268_s29, 2048  ;;  %s1198_s12 = smov [#allocation3]  }
  0x1a   : > { %p1148_p6 = scmp.ne.s32.totalorder %s1268_s29, %s1147_s11  ;;  %s1152_s18 = sshll.u32 %s1198_s12, 4  ;;  %s1153_s18 = int_to_ptr.vmem [resolvable:$false] %s1152_s18 }
  0x1b   : > { %s1154_s19 = scalar_lea.vmem %s1153_s18, 4096  ;;  %p1155_p9 = scmp.lt.s32.totalorder %s1268_s29, %s1153_s18 }
  0x1c   : > { %p1150_p10 = pnand %p1148_p6, %p1134_p11  ;;  %p1156_p0 = scmp.lt.s32.totalorder %s1154_s19, %s1147_s11 }
  0x1e   : > { %p1151_p12 = pneg %p1150_p10  ;;  %p1157_p1 = por %p1156_p0, %p1155_p9 }
  0x20   : > { %p1158_p2 = pnand %p1157_p1, %p1151_p12 }
  0x22   : > { %1161 = shalt.err (!%p1158_p2)
}
  0x23   : > { %s1199_s22 = smov 64   ;;  %s1200_s23 = smov 4  }
  0x24   : > { %1072 = dma.hbm_to_vmem [thread:$0]  (!%p1270_p8), %s1266_s27, 2048, %s1268_s29, %s1275_s4, %s1199_s22, %s1199_s22, %s1200_s23  }
  0x25   : > { %p153_p11 = scmp.lt.s32.totalorder %s1196_s15, 3  ;;  %p1481_p13 = scmp.ge.s32.totalorder %s1196_s15, 1 }
  0x27   : > { %p154_p3 = pnand %p1481_p13, %p153_p11 }
  0x28   : > { %s159_s24 = sand.u32 (!%p154_p3), 1, %s1188_s13  }
  0x29   : > { %157 = sbr.rel (%p154_p3) target bundleno = 340 (0x154), region = 32  ;;  %s883_s25 = sshll.u32 (!%p154_p3), %s159_s24, 7 }
  0x2a   : > { %s160_s26 = scalar_lea.sflag (!%p154_p3), [#allocation4], %s159_s24  ;;  %s1307_s28 = scalar_lea.vmem (!%p154_p3), [#allocation3], %s883_s25 }
  0x30   : > { %1179 = dma.done.wait (%p1257_p7), %s160_s26, 2048  }
  0x31   : > { %1181 = vsyncadd (%p1257_p7), %s160_s26, 4294965248  ;;  %v1108_v0 = vld [vmem:[%s1476_s1] sm:$0xff]   ;;  %v1109_v1 = vld [vmem:[%s1476_s1 + $0x8] sm:$0xff]   ;;  %p186_p7 = scmp.lt.s32.totalorder %s1240_s16, 1  ;;  %vm776_vm0 = vcmask 519168  }
  0x32   : > { %1003 = vmatprep.subr.bf16.mxu0 %v1108_v0  ;;  %1051 = vmatprep.subr.bf16.mxu1 %v1108_v0  ;;  %v1110_v2 = vld [vmem:[%s1476_s1 + $0x10] sm:$0xff]   ;;  %v1111_v3 = vld [vmem:[%s1476_s1 + $0x18] sm:$0xff]   ;;  %v1116_v4 = vld [vmem:[%s1307_s28] sm:$0xff]  }
  0x33   : > { %1004 = vmatpush3.bf16.msra.mxu0 %v1108_v0  ;;  %1059 = vmatpush3.bf16.msra.mxu1 %v1108_v0  ;;  %v1117_v5 = vld [vmem:[%s1307_s28 + $0x40] sm:$0xff]   ;;  %v1113_v7 = vld [vmem:[%s1476_s1 + $0x28] sm:$0xff]   ;;  %v1114_v8 = vld [vmem:[%s1476_s1 + $0x30] sm:$0xff]   ;;  %s1487_s16 = smov (!%p186_p7, %s1240_s16), 1 }
  0x34   : > { %1005 = vmatprep.subr.bf16.mxu0 %v1109_v1  ;;  %1052 = vmatprep.subr.bf16.mxu1 %v1109_v1  ;;  %v1112_v6 = vld [vmem:[%s1476_s1 + $0x20] sm:$0xff]   ;;  %v1115_v9 = vld [vmem:[%s1476_s1 + $0x38] sm:$0xff]   ;;  %v1118_v10 = vld [vmem:[%s1307_s28 + $0x8] sm:$0xff]   ;;  %s946_s24 = sshll.u32 %s1487_s16, 7 }
  0x35   : > { %1019 = vmatprep.mubr.bf16.mxu0 %v1116_v4  ;;  %1035 = vmatprep.mubr.bf16.mxu1 %v1117_v5  ;;  %v1119_v11 = vld [vmem:[%s1307_s28 + $0x48] sm:$0xff]   ;;  %v1120_v12 = vld [vmem:[%s1307_s28 + $0x10] sm:$0xff]   ;;  %v1122_v14 = vld [vmem:[%s1307_s28 + $0x18] sm:$0xff]  }
  0x36   : > { %v1121_v13 = vld [vmem:[%s1307_s28 + $0x50] sm:$0xff]   ;;  %v1123_v15 = vld [vmem:[%s1307_s28 + $0x58] sm:$0xff]   ;;  %v1124_v16 = vld [vmem:[%s1307_s28 + $0x20] sm:$0xff]  }
  0x37   : > { %1006 = vmatpush3.bf16.msra.mxu0 %v1109_v1  ;;  %1060 = vmatpush3.bf16.msra.mxu1 %v1109_v1  ;;  %v1125_v17 = vld [vmem:[%s1307_s28 + $0x60] sm:$0xff]   ;;  %v1126_v18 = vld [vmem:[%s1307_s28 + $0x28] sm:$0xff]   ;;  %v1128_v20 = vld [vmem:[%s1307_s28 + $0x30] sm:$0xff]  }
  0x38   : > { %1007 = vmatprep.subr.bf16.mxu0 %v1110_v2  ;;  %1053 = vmatprep.subr.bf16.mxu1 %v1110_v2  ;;  %v1127_v19 = vld [vmem:[%s1307_s28 + $0x68] sm:$0xff]   ;;  %v1129_v21 = vld [vmem:[%s1307_s28 + $0x70] sm:$0xff]   ;;  %v1130_v22 = vld [vmem:[%s1307_s28 + $0x38] sm:$0xff]  }
  0x39   : > { %v1131_v23 = vld [vmem:[%s1307_s28 + $0x78] sm:$0xff]   ;;  %v1358_v24 = vld [vmem:[%s1477_s2] ss:$0 sm:$0xff]  ;;  %s1367_s28 = scalar_lea.vmem %s1478_s3, %s946_s24 }
  0x3b   : > { %1008 = vmatpush3.bf16.msra.mxu0 %v1110_v2  ;;  %1061 = vmatpush3.bf16.msra.mxu1 %v1110_v2 }
  0x3c   : > { %1009 = vmatprep.subr.bf16.mxu0 %v1111_v3  ;;  %1054 = vmatprep.subr.bf16.mxu1 %v1111_v3 }
  0x3f   : > { %1010 = vmatpush3.bf16.msra.mxu0 %v1111_v3  ;;  %1062 = vmatpush3.bf16.msra.mxu1 %v1111_v3 }
  0x40   : > { %1011 = vmatprep.subr.bf16.mxu0 %v1112_v6  ;;  %1055 = vmatprep.subr.bf16.mxu1 %v1112_v6 }
  0x43   : > { %1012 = vmatpush3.bf16.msra.mxu0 %v1112_v6  ;;  %1063 = vmatpush3.bf16.msra.mxu1 %v1112_v6 }
  0x44   : > { %1013 = vmatprep.subr.bf16.mxu0 %v1113_v7  ;;  %1056 = vmatprep.subr.bf16.mxu1 %v1113_v7 }
  0x47   : > { %1014 = vmatpush3.bf16.msra.mxu0 %v1113_v7  ;;  %1064 = vmatpush3.bf16.msra.mxu1 %v1113_v7 }
  0x48   : > { %1015 = vmatprep.subr.bf16.mxu0 %v1114_v8  ;;  %1057 = vmatprep.subr.bf16.mxu1 %v1114_v8 }
  0x4b   : > { %1016 = vmatpush3.bf16.msra.mxu0 %v1114_v8  ;;  %1065 = vmatpush3.bf16.msra.mxu1 %v1114_v8 }
  0x4c   : > { %1017 = vmatprep.subr.bf16.mxu0 %v1115_v9  ;;  %1058 = vmatprep.subr.bf16.mxu1 %v1115_v9 }
  0x4f   : > { %1018 = vmatpush3.bf16.msra.mxu0 %v1115_v9  ;;  %1066 = vmatpush3.bf16.msra.mxu1 %v1115_v9 }
  0x52   : > { %1020 = vmatmul.mubr.bf16.vlgmr.msra.gmra.mrb[0].mxu0 %v1118_v10  ;;  %1036 = vmatmul.mubr.bf16.vlgmr.msra.gmra.mrb[0].mxu1 %v1119_v11 }
  0x53   : > { %1023 = vmatprep.mubr.bf16.mxu0 %v1120_v12  ;;  %1039 = vmatprep.mubr.bf16.mxu1 %v1121_v13 }
  0x5a   : > { %1024 = vmatmul.mubr.bf16.gmra.mrb[4].mxu0 %v1122_v14  ;;  %1040 = vmatmul.mubr.bf16.gmra.mrb[4].mxu1 %v1123_v15 }
  0x5b   : > { %1027 = vmatprep.mubr.bf16.mxu0 %v1124_v16  ;;  %1043 = vmatprep.mubr.bf16.mxu1 %v1125_v17 }
  0x62   : > { %1028 = vmatmul.mubr.bf16.gmra.mrb[8].mxu0 %v1126_v18  ;;  %1044 = vmatmul.mubr.bf16.gmra.mrb[8].mxu1 %v1127_v19 }
  0x63   : > { %1031 = vmatprep.mubr.bf16.mxu0 %v1128_v20  ;;  %1047 = vmatprep.mubr.bf16.mxu1 %v1129_v21 }
  0x6a   : > { %1032 = vmatmul.mubr.bf16.gmra.mrb[12].mxu0 %v1130_v22  ;;  %1048 = vmatmul.mubr.bf16.gmra.mrb[12].mxu1 %v1131_v23 }
 0x125   : > { %v1021_v25 = vpop.f32.mrb[0].mxu0  ;;  %v1037_v26 = vpop.f32.mrb[0].mxu1 }
 0x126   : > { %v434_v27 = vadd.f32 %v1021_v25, %v1358_v24  ;;  %v498_v28 = vadd.f32 %v1037_v26, %v1358_v24  ;;  %v425_v29 = vpop.f32.mrb[1].mxu0  ;;  %v489_v30 = vpop.f32.mrb[1].mxu1 }
 0x127   : > { %v426_v31 = vadd.f32 %v1358_v24, %v425_v29  ;;  %v490_v32 = vadd.f32 %v1358_v24, %v489_v30  ;;  %v1022_v33 = vpop.f32.mrb[2].mxu0  ;;  %v1038_v34 = vpop.f32.mrb[2].mxu1 }
 0x128   : > { %vm554_vm1 = vcmp.ge.f32.partialorder %v434_v27, 0.0  ;;  %v586_v35 = vmul.f32 0.2, %v434_v27  ;;  %vm570_vm2 = vcmp.ge.f32.partialorder %v498_v28, 0.0  ;;  %v602_v36 = vmul.f32 0.2, %v498_v28 }
 0x129   : > { %vm552_vm3 = vcmp.ge.f32.partialorder %v426_v31, 0.0  ;;  %v584_v37 = vmul.f32 0.2, %v426_v31  ;;  %vm568_vm4 = vcmp.ge.f32.partialorder %v490_v32, 0.0  ;;  %v600_v38 = vmul.f32 0.2, %v490_v32 }
 0x12a   : > { %v618_v39 = vsel %vm554_vm1, %v434_v27, %v586_v35  ;;  %v634_v40 = vsel %vm570_vm2, %v498_v28, %v602_v36  ;;  %v437_v41 = vadd.f32 %v1022_v33, %v1358_v24  ;;  %v501_v42 = vadd.f32 %v1038_v34, %v1358_v24  ;;  %v428_v43 = vpop.f32.mrb[3].mxu0  ;;  %v492_v44 = vpop.f32.mrb[3].mxu1 }
 0x12b   : > { %v949_v45 = vpack.c.bf16 %v618_v39, %v618_v39  ;;  %v965_v46 = vpack.c.bf16 %v634_v40, %v634_v40  ;;  %v616_v47 = vsel %vm552_vm3, %v426_v31, %v584_v37  ;;  %v632_v48 = vsel %vm568_vm4, %v490_v32, %v600_v38 }
 0x12c   : > { %v947_v49 = vpack.c.bf16 %v616_v47, %v616_v47  ;;  %v963_v50 = vpack.c.bf16 %v632_v48, %v632_v48  ;;  %vm555_vm5 = vcmp.ge.f32.partialorder %v437_v41, 0.0  ;;  %v587_v51 = vmul.f32 0.2, %v437_v41 }
 0x12d   : > { %779 = vst.msk [vmem:[%s1367_s28 + $0x8] sm:$0xf] %vm776_vm0, %v949_v45  ;;  %795 = vst.msk [vmem:[%s1367_s28 + $0x48] sm:$0xf] %vm776_vm0, %v965_v46  ;;  %vm571_vm6 = vcmp.ge.f32.partialorder %v501_v42, 0.0  ;;  %v429_v53 = vadd.f32 %v1358_v24, %v428_v43  ;;  %v493_v54 = vadd.f32 %v1358_v24, %v492_v44  ;;  %v1025_v55 = vpop.f32.mrb[4].mxu0 }
 0x12e   : > { %v603_v52 = vmul.f32 0.2, %v501_v42  ;;  %v1041_v56 = vpop.f32.mrb[4].mxu1  ;;  %777 = vst.msk [vmem:[%s1367_s28] sm:$0xf] %vm776_vm0, %v947_v49  ;;  %v619_v57 = vsel %vm555_vm5, %v437_v41, %v587_v51  ;;  %v450_v58 = vadd.f32 %v1025_v55, %v1358_v24  ;;  %v441_v60 = vpop.f32.mrb[5].mxu0 }
 0x12f   : > { %793 = vst.msk [vmem:[%s1367_s28 + $0x40] sm:$0xf] %vm776_vm0, %v963_v50  ;;  %v514_v59 = vadd.f32 %v1041_v56, %v1358_v24  ;;  %v505_v61 = vpop.f32.mrb[5].mxu1  ;;  %v950_v62 = vpack.c.bf16 %v619_v57, %v619_v57  ;;  %vm553_vm7 = vcmp.ge.f32.partialorder %v429_v53, 0.0  ;;  %v585_v0 = vmul.f32 0.2, %v429_v53 }
 0x130   : > { %v635_v63 = vsel %vm571_vm6, %v501_v42, %v603_v52  ;;  %v1026_v1 = vpop.f32.mrb[6].mxu0  ;;  %v1042_v2 = vpop.f32.mrb[6].mxu1  ;;  %vm569_vm8 = vcmp.ge.f32.partialorder %v493_v54, 0.0  ;;  %v601_v4 = vmul.f32 0.2, %v493_v54  ;;  %vm558_vm9 = vcmp.ge.f32.partialorder %v450_v58, 0.0 }
 0x131   : > { %v966_v3 = vpack.c.bf16 %v635_v63, %v635_v63  ;;  %v444_v5 = vpop.f32.mrb[7].mxu0  ;;  %v508_v6 = vpop.f32.mrb[7].mxu1  ;;  %780 = vst.msk [vmem:[%s1367_s28 + $0xc] sm:$0xf] %vm776_vm0, %v950_v62  ;;  %v617_v7 = vsel %vm553_vm7, %v429_v53, %v585_v0  ;;  %v590_v8 = vmul.f32 0.2, %v450_v58  ;;  %v442_v12 = vadd.f32 %v1358_v24, %v441_v60 }
 0x132   : > { %vm574_vm10 = vcmp.ge.f32.partialorder %v514_v59, 0.0  ;;  %v606_v9 = vmul.f32 0.2, %v514_v59  ;;  %v948_v10 = vpack.c.bf16 %v617_v7, %v617_v7  ;;  %v633_v11 = vsel %vm569_vm8, %v493_v54, %v601_v4 }
 0x133   : > { %796 = vst.msk [vmem:[%s1367_s28 + $0x4c] sm:$0xf] %vm776_vm0, %v966_v3  ;;  %v506_v13 = vadd.f32 %v1358_v24, %v505_v61  ;;  %v964_v14 = vpack.c.bf16 %v633_v11, %v633_v11  ;;  %v622_v15 = vsel %vm558_vm9, %v450_v58, %v590_v8  ;;  %v453_v17 = vadd.f32 %v1026_v1, %v1358_v24 }
 0x134   : > { %v638_v16 = vsel %vm574_vm10, %v514_v59, %v606_v9  ;;  %778 = vst.msk [vmem:[%s1367_s28 + $0x4] sm:$0xf] %vm776_vm0, %v948_v10  ;;  %v953_v18 = vpack.c.bf16 %v622_v15, %v622_v15  ;;  %vm556_vm11 = vcmp.ge.f32.partialorder %v442_v12, 0.0  ;;  %v588_v20 = vmul.f32 0.2, %v442_v12 }
 0x135   : > { %v969_v19 = vpack.c.bf16 %v638_v16, %v638_v16  ;;  %794 = vst.msk [vmem:[%s1367_s28 + $0x44] sm:$0xf] %vm776_vm0, %v964_v14  ;;  %vm572_vm12 = vcmp.ge.f32.partialorder %v506_v13, 0.0  ;;  %v604_v21 = vmul.f32 0.2, %v506_v13  ;;  %vm559_vm13 = vcmp.ge.f32.partialorder %v453_v17, 0.0 }
 0x136   : > { %v591_v22 = vmul.f32 0.2, %v453_v17  ;;  %783 = vst.msk [vmem:[%s1367_s28 + $0x18] sm:$0xf] %vm776_vm0, %v953_v18  ;;  %v620_v23 = vsel %vm556_vm11, %v442_v12, %v588_v20  ;;  %v517_v25 = vadd.f32 %v1042_v2, %v1358_v24  ;;  %v445_v26 = vadd.f32 %v1358_v24, %v444_v5  ;;  %v1029_v28 = vpop.f32.mrb[8].mxu0  ;;  %v1045_v29 = vpop.f32.mrb[8].mxu1 }
 0x137   : > { %799 = vst.msk [vmem:[%s1367_s28 + $0x58] sm:$0xf] %vm776_vm0, %v969_v19  ;;  %v509_v27 = vadd.f32 %v1358_v24, %v508_v6  ;;  %v951_v30 = vpack.c.bf16 %v620_v23, %v620_v23  ;;  %v636_v31 = vsel %vm572_vm12, %v506_v13, %v604_v21  ;;  %v466_v33 = vadd.f32 %v1029_v28, %v1358_v24  ;;  %v457_v34 = vpop.f32.mrb[9].mxu0  ;;  %v521_v35 = vpop.f32.mrb[9].mxu1 }
 0x138   : > { %v623_v32 = vsel %vm559_vm13, %v453_v17, %v591_v22  ;;  %v967_v36 = vpack.c.bf16 %v636_v31, %v636_v31  ;;  %vm575_vm14 = vcmp.ge.f32.partialorder %v517_v25, 0.0  ;;  %v607_v38 = vmul.f32 0.2, %v517_v25  ;;  %v1030_v39 = vpop.f32.mrb[10].mxu0  ;;  %v1046_v40 = vpop.f32.mrb[10].mxu1 }
 0x139   : > { %v954_v37 = vpack.c.bf16 %v623_v32, %v623_v32  ;;  %781 = vst.msk [vmem:[%s1367_s28 + $0x10] sm:$0xf] %vm776_vm0, %v951_v30  ;;  %vm557_vm15 = vcmp.ge.f32.partialorder %v445_v26, 0.0  ;;  %v589_v41 = vmul.f32 0.2, %v445_v26  ;;  %vm573_vm1 = vcmp.ge.f32.partialorder %v509_v27, 0.0 }
 0x13a   : > { %v605_v42 = vmul.f32 0.2, %v509_v27  ;;  %797 = vst.msk [vmem:[%s1367_s28 + $0x50] sm:$0xf] %vm776_vm0, %v967_v36  ;;  %v639_v43 = vsel %vm575_vm14, %v517_v25, %v607_v38  ;;  %vm562_vm2 = vcmp.ge.f32.partialorder %v466_v33, 0.0  ;;  %v530_v45 = vadd.f32 %v1045_v29, %v1358_v24  ;;  %v460_v46 = vpop.f32.mrb[11].mxu0 }
 0x13b   : > { %784 = vst.msk [vmem:[%s1367_s28 + $0x1c] sm:$0xf] %vm776_vm0, %v954_v37  ;;  %v594_v44 = vmul.f32 0.2, %v466_v33  ;;  %v524_v47 = vpop.f32.mrb[11].mxu1  ;;  %v970_v48 = vpack.c.bf16 %v639_v43, %v639_v43  ;;  %v621_v49 = vsel %vm557_vm15, %v445_v26, %v589_v41  ;;  %v458_v51 = vadd.f32 %v1358_v24, %v457_v34 }
 0x13c   : > { %v637_v50 = vsel %vm573_vm1, %v509_v27, %v605_v42  ;;  %v952_v52 = vpack.c.bf16 %v621_v49, %v621_v49  ;;  %vm578_vm3 = vcmp.ge.f32.partialorder %v530_v45, 0.0  ;;  %v610_v56 = vmul.f32 0.2, %v530_v45 }
 0x13d   : > { %v968_v53 = vpack.c.bf16 %v637_v50, %v637_v50  ;;  %v626_v54 = vsel %vm562_vm2, %v466_v33, %v594_v44  ;;  %800 = vst.msk [vmem:[%s1367_s28 + $0x5c] sm:$0xf] %vm776_vm0, %v970_v48  ;;  %vm560_vm4 = vcmp.ge.f32.partialorder %v458_v51, 0.0  ;;  %v592_v57 = vmul.f32 0.2, %v458_v51  ;;  %v1033_v58 = vpop.f32.mrb[12].mxu0 }
 0x13e   : > { %v957_v55 = vpack.c.bf16 %v626_v54, %v626_v54  ;;  %782 = vst.msk [vmem:[%s1367_s28 + $0x14] sm:$0xf] %vm776_vm0, %v952_v52  ;;  %v522_v59 = vadd.f32 %v1358_v24, %v521_v35  ;;  %v469_v60 = vadd.f32 %v1030_v39, %v1358_v24  ;;  %v533_v61 = vadd.f32 %v1046_v40, %v1358_v24  ;;  %v1049_v63 = vpop.f32.mrb[12].mxu1  ;;  %v473_v0 = vpop.f32.mrb[13].mxu0 }
 0x13f   : > { %798 = vst.msk [vmem:[%s1367_s28 + $0x54] sm:$0xf] %vm776_vm0, %v968_v53  ;;  %v461_v62 = vadd.f32 %v1358_v24, %v460_v46  ;;  %v642_v1 = vsel %vm578_vm3, %v530_v45, %v610_v56  ;;  %v624_v2 = vsel %vm560_vm4, %v458_v51, %v592_v57  ;;  %v525_v3 = vadd.f32 %v1358_v24, %v524_v47  ;;  %v537_v5 = vpop.f32.mrb[13].mxu1  ;;  %v1034_v6 = vpop.f32.mrb[14].mxu0 }
 0x140   : > { %787 = vst.msk [vmem:[%s1367_s28 + $0x28] sm:$0xf] %vm776_vm0, %v957_v55  ;;  %v482_v4 = vadd.f32 %v1033_v58, %v1358_v24  ;;  %v973_v7 = vpack.c.bf16 %v642_v1, %v642_v1  ;;  %v955_v8 = vpack.c.bf16 %v624_v2, %v624_v2  ;;  %vm576_vm5 = vcmp.ge.f32.partialorder %v522_v59, 0.0  ;;  %v1050_v10 = vpop.f32.mrb[14].mxu1  ;;  %v476_v11 = vpop.f32.mrb[15].mxu0 }
 0x141   : > { %v608_v9 = vmul.f32 0.2, %v522_v59  ;;  %vm563_vm6 = vcmp.ge.f32.partialorder %v469_v60, 0.0  ;;  %v595_v12 = vmul.f32 0.2, %v469_v60  ;;  %vm579_vm7 = vcmp.ge.f32.partialorder %v533_v61, 0.0 }
 0x142   : > { %v611_v13 = vmul.f32 0.2, %v533_v61  ;;  %803 = vst.msk [vmem:[%s1367_s28 + $0x68] sm:$0xf] %vm776_vm0, %v973_v7  ;;  %785 = vst.msk [vmem:[%s1367_s28 + $0x20] sm:$0xf] %vm776_vm0, %v955_v8  ;;  %v546_v28 = vadd.f32 %v1049_v63, %v1358_v24  ;;  %v474_v30 = vadd.f32 %v1358_v24, %v473_v0  ;;  %v538_v31 = vadd.f32 %v1358_v24, %v537_v5 }
 0x143   : > { %v640_v14 = vsel %vm576_vm5, %v522_v59, %v608_v9  ;;  %vm561_vm8 = vcmp.ge.f32.partialorder %v461_v62, 0.0  ;;  %v593_v15 = vmul.f32 0.2, %v461_v62  ;;  %vm577_vm9 = vcmp.ge.f32.partialorder %v525_v3, 0.0  ;;  %v540_v16 = vpop.f32.mrb[15].mxu1 }
 0x144   : > { %v971_v17 = vpack.c.bf16 %v640_v14, %v640_v14  ;;  %v627_v18 = vsel %vm563_vm6, %v469_v60, %v595_v12  ;;  %v643_v19 = vsel %vm579_vm7, %v533_v61, %v611_v13  ;;  %v609_v20 = vmul.f32 0.2, %v525_v3 }
 0x145   : > { %v958_v21 = vpack.c.bf16 %v627_v18, %v627_v18  ;;  %v974_v22 = vpack.c.bf16 %v643_v19, %v643_v19  ;;  %v625_v23 = vsel %vm561_vm8, %v461_v62, %v593_v15  ;;  %vm566_vm10 = vcmp.ge.f32.partialorder %v482_v4, 0.0 }
 0x146   : > { %801 = vst.msk [vmem:[%s1367_s28 + $0x60] sm:$0xf] %vm776_vm0, %v971_v17  ;;  %v956_v25 = vpack.c.bf16 %v625_v23, %v625_v23  ;;  %v641_v26 = vsel %vm577_vm9, %v525_v3, %v609_v20  ;;  %v598_v27 = vmul.f32 0.2, %v482_v4  ;;  %v485_v32 = vadd.f32 %v1034_v6, %v1358_v24 }
 0x147   : > { %788 = vst.msk [vmem:[%s1367_s28 + $0x2c] sm:$0xf] %vm776_vm0, %v958_v21  ;;  %804 = vst.msk [vmem:[%s1367_s28 + $0x6c] sm:$0xf] %vm776_vm0, %v974_v22  ;;  %v972_v29 = vpack.c.bf16 %v641_v26, %v641_v26  ;;  %vm582_vm11 = vcmp.ge.f32.partialorder %v546_v28, 0.0  ;;  %v549_v35 = vadd.f32 %v1050_v10, %v1358_v24  ;;  %vm564_vm12 = vcmp.ge.f32.partialorder %v474_v30, 0.0 }
 0x148   : > { %786 = vst.msk [vmem:[%s1367_s28 + $0x24] sm:$0xf] %vm776_vm0, %v956_v25  ;;  %v630_v33 = vsel %vm566_vm10, %v482_v4, %v598_v27  ;;  %v614_v34 = vmul.f32 0.2, %v546_v28  ;;  %v596_v37 = vmul.f32 0.2, %v474_v30  ;;  %v477_v47 = vadd.f32 %v1358_v24, %v476_v11 }
 0x149   : > { %802 = vst.msk [vmem:[%s1367_s28 + $0x64] sm:$0xf] %vm776_vm0, %v972_v29  ;;  %v961_v36 = vpack.c.bf16 %v630_v33, %v630_v33  ;;  %vm580_vm13 = vcmp.ge.f32.partialorder %v538_v31, 0.0  ;;  %v612_v39 = vmul.f32 0.2, %v538_v31  ;;  %vm567_vm14 = vcmp.ge.f32.partialorder %v485_v32, 0.0 }
 0x14a   : > { %v646_v38 = vsel %vm582_vm11, %v546_v28, %v614_v34  ;;  %v599_v40 = vmul.f32 0.2, %v485_v32  ;;  %v628_v42 = vsel %vm564_vm12, %v474_v30, %v596_v37  ;;  %vm583_vm15 = vcmp.ge.f32.partialorder %v549_v35, 0.0 }
 0x14b   : > { %791 = vst.msk [vmem:[%s1367_s28 + $0x38] sm:$0xf] %vm776_vm0, %v961_v36  ;;  %v977_v41 = vpack.c.bf16 %v646_v38, %v646_v38  ;;  %v615_v43 = vmul.f32 0.2, %v549_v35  ;;  %v959_v44 = vpack.c.bf16 %v628_v42, %v628_v42  ;;  %v644_v45 = vsel %vm580_vm13, %v538_v31, %v612_v39 }
 0x14c   : > { %v631_v46 = vsel %vm567_vm14, %v485_v32, %v599_v40  ;;  %v975_v48 = vpack.c.bf16 %v644_v45, %v644_v45  ;;  %v541_v51 = vadd.f32 %v1358_v24, %v540_v16  ;;  %vm565_vm1 = vcmp.ge.f32.partialorder %v477_v47, 0.0 }
 0x14d   : > { %807 = vst.msk [vmem:[%s1367_s28 + $0x78] sm:$0xf] %vm776_vm0, %v977_v41  ;;  %v962_v49 = vpack.c.bf16 %v631_v46, %v631_v46  ;;  %v647_v50 = vsel %vm583_vm15, %v549_v35, %v615_v43  ;;  %789 = vst.msk [vmem:[%s1367_s28 + $0x30] sm:$0xf] %vm776_vm0, %v959_v44  ;;  %v597_v53 = vmul.f32 0.2, %v477_v47 }
 0x14e   : > { %v978_v52 = vpack.c.bf16 %v647_v50, %v647_v50  ;;  %805 = vst.msk [vmem:[%s1367_s28 + $0x70] sm:$0xf] %vm776_vm0, %v975_v48  ;;  %vm581_vm2 = vcmp.ge.f32.partialorder %v541_v51, 0.0  ;;  %v613_v54 = vmul.f32 0.2, %v541_v51 }
 0x14f   : > { %792 = vst.msk [vmem:[%s1367_s28 + $0x3c] sm:$0xf] %vm776_vm0, %v962_v49  ;;  %v629_v55 = vsel %vm565_vm1, %v477_v47, %v597_v53 }
 0x150   : > { %808 = vst.msk [vmem:[%s1367_s28 + $0x7c] sm:$0xf] %vm776_vm0, %v978_v52  ;;  %v960_v56 = vpack.c.bf16 %v629_v55, %v629_v55  ;;  %v645_v57 = vsel %vm581_vm2, %v541_v51, %v613_v54 }
 0x151   : > { %v976_v58 = vpack.c.bf16 %v645_v57, %v645_v57 }
 0x152   : > { %790 = vst.msk [vmem:[%s1367_s28 + $0x34] sm:$0xf] %vm776_vm0, %v960_v56 }
 0x153   : > { %806 = vst.msk [vmem:[%s1367_s28 + $0x74] sm:$0xf] %vm776_vm0, %v976_v58 }
 0x154 PF: > { %p13_p8 = scmp.ge.s32.totalorder %s1243_s17, 4   ;;  %s1482_s12 = smov %s1188_s13 }
 0x155   : > { %s1483_s13 = smov %s1192_s14  ;;  %s1484_s14 = smov %s1253_s20 }
 0x156   : > { %s1485_s15 = smov %s1243_s17  ;;  %15 = sbr.rel (!%p13_p8) target bundleno = 3 (0x3), region = 72 }
 0x15d   :  { %830 = vsyncpa [#allocation4], 1 }
 0x15e   :  { %832 = vsyncpa [#allocation4 + $0x1], 1 }

</bundles_post_ra>
